<compile_context>
chip_gen: v5e
topology: v5e:2x2
jax: 0.10.0
libtpu: 0.0.40
codegen_flags: <defaults>
</compile_context>

<pallas_src>
import math

import jax
import jax.numpy as jnp
from jax import lax
from jax.experimental import pallas as pl
from jax.experimental.pallas import tpu as pltpu


def _sigmoid(z):
    # Hand-rolled so kernel and reference use the exact same formulation.
    return 1.0 / (1.0 + jnp.exp(-z))


def _ssa_kernel(x_ref, w3_ref, w1_ref, wa_ref, o_ref):
    """One batch element per grid step.

    x_ref  : (1, C, H, W) VMEM block of the input
    w3_ref : (3, 3)   SMEM -- spatial_wise 3x3 conv weight
    w1_ref : (1, 1)   SMEM -- spatial_wise 1x1 conv weight (scalar)
    wa_ref : (F, C)   SMEM -- attention_wise 1x1 conv weight
    o_ref  : (1, F, H, W) VMEM output block
    """
    x = x_ref[0].astype(jnp.float32)            # (C, H, W), f32 accumulation
    C, H, W = x.shape
    F = o_ref.shape[1]

    # ---- channel mean ---------------------------------------------------
    g = x[0]
    for c in range(1, C):
        g = g + x[c]
    g = g * (1.0 / C)                           # (H, W)

    # ---- spatial_wise: conv3x3 (pad=1, no bias) -> ReLU -> conv1x1 -> sigmoid
    # Zero-pad the channel mean in-register, then accumulate the 9 taps
    # (cross-correlation, matching torch.nn.Conv2d).
    zrow = jnp.zeros((1, W), jnp.float32)
    zcol = jnp.zeros((H + 2, 1), jnp.float32)
    gp = jnp.concatenate([zrow, g, zrow], axis=0)     # (H+2, W)
    gp = jnp.concatenate([zcol, gp, zcol], axis=1)    # (H+2, W+2)

    s = jnp.zeros((H, W), jnp.float32)
    for a in range(3):
        for b in range(3):
            s = s + w3_ref[a, b] * gp[a:a + H, b:b + W]

    s = jnp.maximum(s, 0.0)                     # ReLU
    s = _sigmoid(w1_ref[0, 0] * s)              # 1x1 conv (scalar) + Sigmoid

    # ---- residual add + attention_wise (1x1 conv C->F, no bias) + sigmoid
    y = [x[c] + s for c in range(C)]            # per-channel (H, W)
    for f in range(F):
        acc = jnp.zeros((H, W), jnp.float32)
        for c in range(C):
            acc = acc + wa_ref[f, c] * y[c]
        o_ref[0, f, :, :] = _sigmoid(acc).astype(o_ref.dtype)


@jax.jit
def scale_spatial_attention(x, w_spatial3, w_spatial1, w_attn):
    """x: (N,C,H,W); w_spatial3: (1,1,3,3); w_spatial1: (1,1,1,1);
    w_attn: (F,C,1,1).  Returns (N,F,H,W) in x.dtype."""
    N, C, H, W = x.shape
    F = w_attn.shape[0]

    w3 = w_spatial3.reshape(3, 3).astype(jnp.float32)
    w1 = w_spatial1.reshape(1, 1).astype(jnp.float32)
    wa = w_attn.reshape(F, C).astype(jnp.float32)

    return pl.pallas_call(
        _ssa_kernel,
        out_shape=jax.ShapeDtypeStruct((N, F, H, W), x.dtype),
        grid_spec=pltpu.PrefetchScalarGridSpec(
            num_scalar_prefetch=0,
            grid=(N,),
            in_specs=[
                pl.BlockSpec((1, C, H, W), lambda n: (n, 0, 0, 0)),
                pl.BlockSpec(memory_space=pltpu.MemorySpace.SMEM),
                pl.BlockSpec(memory_space=pltpu.MemorySpace.SMEM),
                pl.BlockSpec(memory_space=pltpu.MemorySpace.SMEM),
            ],
            out_specs=pl.BlockSpec((1, F, H, W), lambda n: (n, 0, 0, 0)),
        ),
        compiler_params=pltpu.CompilerParams(
            dimension_semantics=("parallel",)),
    )(x, w3, w1, wa)


def _reference(x, w_spatial3, w_spatial1, w_attn):
    """Pure-JAX mirror of the PyTorch module (independent conv implementation)."""
    N, C, H, W = x.shape
    F = w_attn.shape[0]
    g = jnp.mean(x, axis=1, keepdims=True)                       # (N,1,H,W)
    s = lax.conv_general_dilated(
        g, w_spatial3.reshape(1, 1, 3, 3).astype(jnp.float32),
        window_strides=(1, 1), padding=((1, 1), (1, 1)),
        dimension_numbers=("NCHW", "OIHW", "NCHW"),
        precision=lax.Precision.HIGHEST)
    s = jnp.maximum(s, 0.0)
    s = _sigmoid(w_spatial1.reshape(()) * s)
    y = s + x                                                    # (N,C,H,W)
    out = jnp.einsum("fc,nchw->nfhw",
                     w_attn.reshape(F, C).astype(jnp.float32), y,
                     precision=lax.Precision.HIGHEST)
    return _sigmoid(out)


if __name__ == "__main__":
    # in_planes = 4, num_features = 4, batch = 2, spatial = 16x16
    N, C, F, H, W = 2, 4, 4, 16, 16

    key = jax.random.PRNGKey(0)
    kx, k3, k1, ka = jax.random.split(key, 4)

    x = jax.random.normal(kx, (N, C, H, W), jnp.float32)
    # Kaiming-normal-ish (fan_out, relu) deterministic weights.
    w3 = jax.random.normal(k3, (1, 1, 3, 3), jnp.float32) * math.sqrt(2.0 / 9.0)
    w1 = jax.random.normal(k1, (1, 1, 1, 1), jnp.float32) * math.sqrt(2.0)
    wa = jax.random.normal(ka, (F, C, 1, 1), jnp.float32) * math.sqrt(2.0 / F)

    out = scale_spatial_attention(x, w3, w1, wa)
    out = jax.block_until_ready(out)

    ref = jax.block_until_ready(_reference(x, w3, w1, wa))

    assert out.shape == (N, F, H, W), out.shape
    max_err = float(jnp.max(jnp.abs(out.astype(jnp.float32) - ref)))
    assert max_err < 1e-4, f"max abs error {max_err}"

    print("KERNEL_OK")
</pallas_src>

<mosaic_0001>
module attributes {stable_mosaic.version = 11 : i64} {
  func.func @_ssa_kernel(%arg0: i32, %arg1: memref<1x4x16x16xf32, #tpu.memory_space<vmem>>, %arg2: memref<3x3xf32, #tpu.memory_space<smem>>, %arg3: memref<1x1xf32, #tpu.memory_space<smem>>, %arg4: memref<4x4xf32, #tpu.memory_space<smem>>, %arg5: memref<1x4x16x16xf32, #tpu.memory_space<vmem>>) attributes {dimension_semantics = [#tpu.dimension_semantics<parallel>], iteration_bounds = array<i64: 2>, scalar_prefetch = 0 : i64, scratch_operands = 0 : i64, tpu.core_type = #tpu.core_type<tc>, window_params = [{transform_indices = @transform_0, window_bounds = array<i64: 1, 4, 16, 16>}, {transform_indices = @transform_1, window_bounds = array<i64: 3, 3>}, {transform_indices = @transform_2, window_bounds = array<i64: 1, 1>}, {transform_indices = @transform_3, window_bounds = array<i64: 4, 4>}, {transform_indices = @transform_4, window_bounds = array<i64: 1, 4, 16, 16>}]} {
    %c0 = arith.constant 0 : index
    %c0_0 = arith.constant 0 : index
    %c0_1 = arith.constant 0 : index
    %c0_2 = arith.constant 0 : index
    %0 = vector.load %arg1[%c0, %c0_0, %c0_1, %c0_2] : memref<1x4x16x16xf32, #tpu.memory_space<vmem>>, vector<1x4x16x16xf32>
    %1 = vector.shape_cast %0 : vector<1x4x16x16xf32> to vector<4x16x16xf32>
    %2 = vector.extract_strided_slice %1 {offsets = [0, 0, 0], sizes = [1, 16, 16], strides = [1, 1, 1]} : vector<4x16x16xf32> to vector<1x16x16xf32>
    %3 = vector.shape_cast %2 : vector<1x16x16xf32> to vector<16x16xf32>
    %4 = vector.extract_strided_slice %1 {offsets = [1, 0, 0], sizes = [1, 16, 16], strides = [1, 1, 1]} : vector<4x16x16xf32> to vector<1x16x16xf32>
    %5 = vector.shape_cast %4 : vector<1x16x16xf32> to vector<16x16xf32>
    %6 = arith.addf %3, %5 : vector<16x16xf32>
    %7 = vector.extract_strided_slice %1 {offsets = [2, 0, 0], sizes = [1, 16, 16], strides = [1, 1, 1]} : vector<4x16x16xf32> to vector<1x16x16xf32>
    %8 = vector.shape_cast %7 : vector<1x16x16xf32> to vector<16x16xf32>
    %9 = arith.addf %6, %8 : vector<16x16xf32>
    %10 = vector.extract_strided_slice %1 {offsets = [3, 0, 0], sizes = [1, 16, 16], strides = [1, 1, 1]} : vector<4x16x16xf32> to vector<1x16x16xf32>
    %11 = vector.shape_cast %10 : vector<1x16x16xf32> to vector<16x16xf32>
    %12 = arith.addf %9, %11 : vector<16x16xf32>
    %cst = arith.constant 2.500000e-01 : f32
    %13 = vector.broadcast %cst : f32 to vector<16x16xf32>
    %14 = arith.mulf %12, %13 : vector<16x16xf32>
    %cst_3 = arith.constant 0.000000e+00 : f32
    %15 = vector.broadcast %cst_3 : f32 to vector<1x16xf32>
    %cst_4 = arith.constant 0.000000e+00 : f32
    %16 = vector.broadcast %cst_4 : f32 to vector<18x1xf32>
    %17 = tpu.concatenate %15, %14, %15 in 0 : vector<1x16xf32>, vector<16x16xf32>, vector<1x16xf32> -> vector<18x16xf32>
    %18 = tpu.concatenate %16, %17, %16 in 1 : vector<18x1xf32>, vector<18x16xf32>, vector<18x1xf32> -> vector<18x18xf32>
    %cst_5 = arith.constant 0.000000e+00 : f32
    %19 = vector.broadcast %cst_5 : f32 to vector<16x16xf32>
    %c0_6 = arith.constant 0 : index
    %c0_7 = arith.constant 0 : index
    %20 = memref.load %arg2[%c0_6, %c0_7] : memref<3x3xf32, #tpu.memory_space<smem>>
    %21 = vector.extract_strided_slice %18 {offsets = [0, 0], sizes = [16, 16], strides = [1, 1]} : vector<18x18xf32> to vector<16x16xf32>
    %22 = vector.broadcast %20 : f32 to vector<16x16xf32>
    %23 = arith.mulf %22, %21 : vector<16x16xf32>
    %24 = arith.addf %19, %23 : vector<16x16xf32>
    %c0_8 = arith.constant 0 : index
    %c1 = arith.constant 1 : index
    %25 = memref.load %arg2[%c0_8, %c1] : memref<3x3xf32, #tpu.memory_space<smem>>
    %26 = vector.extract_strided_slice %18 {offsets = [0, 1], sizes = [16, 16], strides = [1, 1]} : vector<18x18xf32> to vector<16x16xf32>
    %27 = vector.broadcast %25 : f32 to vector<16x16xf32>
    %28 = arith.mulf %27, %26 : vector<16x16xf32>
    %29 = arith.addf %24, %28 : vector<16x16xf32>
    %c0_9 = arith.constant 0 : index
    %c2 = arith.constant 2 : index
    %30 = memref.load %arg2[%c0_9, %c2] : memref<3x3xf32, #tpu.memory_space<smem>>
    %31 = vector.extract_strided_slice %18 {offsets = [0, 2], sizes = [16, 16], strides = [1, 1]} : vector<18x18xf32> to vector<16x16xf32>
    %32 = vector.broadcast %30 : f32 to vector<16x16xf32>
    %33 = arith.mulf %32, %31 : vector<16x16xf32>
    %34 = arith.addf %29, %33 : vector<16x16xf32>
    %c1_10 = arith.constant 1 : index
    %c0_11 = arith.constant 0 : index
    %35 = memref.load %arg2[%c1_10, %c0_11] : memref<3x3xf32, #tpu.memory_space<smem>>
    %36 = vector.extract_strided_slice %18 {offsets = [1, 0], sizes = [16, 16], strides = [1, 1]} : vector<18x18xf32> to vector<16x16xf32>
    %37 = vector.broadcast %35 : f32 to vector<16x16xf32>
    %38 = arith.mulf %37, %36 : vector<16x16xf32>
    %39 = arith.addf %34, %38 : vector<16x16xf32>
    %c1_12 = arith.constant 1 : index
    %c1_13 = arith.constant 1 : index
    %40 = memref.load %arg2[%c1_12, %c1_13] : memref<3x3xf32, #tpu.memory_space<smem>>
    %41 = vector.extract_strided_slice %18 {offsets = [1, 1], sizes = [16, 16], strides = [1, 1]} : vector<18x18xf32> to vector<16x16xf32>
    %42 = vector.broadcast %40 : f32 to vector<16x16xf32>
    %43 = arith.mulf %42, %41 : vector<16x16xf32>
    %44 = arith.addf %39, %43 : vector<16x16xf32>
    %c1_14 = arith.constant 1 : index
    %c2_15 = arith.constant 2 : index
    %45 = memref.load %arg2[%c1_14, %c2_15] : memref<3x3xf32, #tpu.memory_space<smem>>
    %46 = vector.extract_strided_slice %18 {offsets = [1, 2], sizes = [16, 16], strides = [1, 1]} : vector<18x18xf32> to vector<16x16xf32>
    %47 = vector.broadcast %45 : f32 to vector<16x16xf32>
    %48 = arith.mulf %47, %46 : vector<16x16xf32>
    %49 = arith.addf %44, %48 : vector<16x16xf32>
    %c2_16 = arith.constant 2 : index
    %c0_17 = arith.constant 0 : index
    %50 = memref.load %arg2[%c2_16, %c0_17] : memref<3x3xf32, #tpu.memory_space<smem>>
    %51 = vector.extract_strided_slice %18 {offsets = [2, 0], sizes = [16, 16], strides = [1, 1]} : vector<18x18xf32> to vector<16x16xf32>
    %52 = vector.broadcast %50 : f32 to vector<16x16xf32>
    %53 = arith.mulf %52, %51 : vector<16x16xf32>
    %54 = arith.addf %49, %53 : vector<16x16xf32>
    %c2_18 = arith.constant 2 : index
    %c1_19 = arith.constant 1 : index
    %55 = memref.load %arg2[%c2_18, %c1_19] : memref<3x3xf32, #tpu.memory_space<smem>>
    %56 = vector.extract_strided_slice %18 {offsets = [2, 1], sizes = [16, 16], strides = [1, 1]} : vector<18x18xf32> to vector<16x16xf32>
    %57 = vector.broadcast %55 : f32 to vector<16x16xf32>
    %58 = arith.mulf %57, %56 : vector<16x16xf32>
    %59 = arith.addf %54, %58 : vector<16x16xf32>
    %c2_20 = arith.constant 2 : index
    %c2_21 = arith.constant 2 : index
    %60 = memref.load %arg2[%c2_20, %c2_21] : memref<3x3xf32, #tpu.memory_space<smem>>
    %61 = vector.extract_strided_slice %18 {offsets = [2, 2], sizes = [16, 16], strides = [1, 1]} : vector<18x18xf32> to vector<16x16xf32>
    %62 = vector.broadcast %60 : f32 to vector<16x16xf32>
    %63 = arith.mulf %62, %61 : vector<16x16xf32>
    %64 = arith.addf %59, %63 : vector<16x16xf32>
    %cst_22 = arith.constant 0.000000e+00 : f32
    %65 = vector.broadcast %cst_22 : f32 to vector<16x16xf32>
    %66 = arith.maximumf %64, %65 : vector<16x16xf32>
    %c0_23 = arith.constant 0 : index
    %c0_24 = arith.constant 0 : index
    %67 = memref.load %arg3[%c0_23, %c0_24] : memref<1x1xf32, #tpu.memory_space<smem>>
    %68 = vector.broadcast %67 : f32 to vector<16x16xf32>
    %69 = arith.mulf %68, %66 : vector<16x16xf32>
    %cst_25 = arith.constant 0.000000e+00 : f32
    %70 = vector.broadcast %cst_25 : f32 to vector<16x16xf32>
    %71 = arith.subf %70, %69 : vector<16x16xf32>
    %72 = math.exp %71 : vector<16x16xf32>
    %cst_26 = arith.constant 1.000000e+00 : f32
    %73 = vector.broadcast %cst_26 : f32 to vector<16x16xf32>
    %74 = arith.addf %73, %72 : vector<16x16xf32>
    %cst_27 = arith.constant 1.000000e+00 : f32
    %75 = vector.broadcast %cst_27 : f32 to vector<16x16xf32>
    %76 = arith.divf %75, %74 : vector<16x16xf32>
    %77 = vector.extract_strided_slice %1 {offsets = [0, 0, 0], sizes = [1, 16, 16], strides = [1, 1, 1]} : vector<4x16x16xf32> to vector<1x16x16xf32>
    %78 = vector.shape_cast %77 : vector<1x16x16xf32> to vector<16x16xf32>
    %79 = arith.addf %78, %76 : vector<16x16xf32>
    %80 = vector.extract_strided_slice %1 {offsets = [1, 0, 0], sizes = [1, 16, 16], strides = [1, 1, 1]} : vector<4x16x16xf32> to vector<1x16x16xf32>
    %81 = vector.shape_cast %80 : vector<1x16x16xf32> to vector<16x16xf32>
    %82 = arith.addf %81, %76 : vector<16x16xf32>
    %83 = vector.extract_strided_slice %1 {offsets = [2, 0, 0], sizes = [1, 16, 16], strides = [1, 1, 1]} : vector<4x16x16xf32> to vector<1x16x16xf32>
    %84 = vector.shape_cast %83 : vector<1x16x16xf32> to vector<16x16xf32>
    %85 = arith.addf %84, %76 : vector<16x16xf32>
    %86 = vector.extract_strided_slice %1 {offsets = [3, 0, 0], sizes = [1, 16, 16], strides = [1, 1, 1]} : vector<4x16x16xf32> to vector<1x16x16xf32>
    %87 = vector.shape_cast %86 : vector<1x16x16xf32> to vector<16x16xf32>
    %88 = arith.addf %87, %76 : vector<16x16xf32>
    %cst_28 = arith.constant 0.000000e+00 : f32
    %89 = vector.broadcast %cst_28 : f32 to vector<16x16xf32>
    %c0_29 = arith.constant 0 : index
    %c0_30 = arith.constant 0 : index
    %90 = memref.load %arg4[%c0_29, %c0_30] : memref<4x4xf32, #tpu.memory_space<smem>>
    %91 = vector.broadcast %90 : f32 to vector<16x16xf32>
    %92 = arith.mulf %91, %79 : vector<16x16xf32>
    %93 = arith.addf %89, %92 : vector<16x16xf32>
    %c0_31 = arith.constant 0 : index
    %c1_32 = arith.constant 1 : index
    %94 = memref.load %arg4[%c0_31, %c1_32] : memref<4x4xf32, #tpu.memory_space<smem>>
    %95 = vector.broadcast %94 : f32 to vector<16x16xf32>
    %96 = arith.mulf %95, %82 : vector<16x16xf32>
    %97 = arith.addf %93, %96 : vector<16x16xf32>
    %c0_33 = arith.constant 0 : index
    %c2_34 = arith.constant 2 : index
    %98 = memref.load %arg4[%c0_33, %c2_34] : memref<4x4xf32, #tpu.memory_space<smem>>
    %99 = vector.broadcast %98 : f32 to vector<16x16xf32>
    %100 = arith.mulf %99, %85 : vector<16x16xf32>
    %101 = arith.addf %97, %100 : vector<16x16xf32>
    %c0_35 = arith.constant 0 : index
    %c3 = arith.constant 3 : index
    %102 = memref.load %arg4[%c0_35, %c3] : memref<4x4xf32, #tpu.memory_space<smem>>
    %103 = vector.broadcast %102 : f32 to vector<16x16xf32>
    %104 = arith.mulf %103, %88 : vector<16x16xf32>
    %105 = arith.addf %101, %104 : vector<16x16xf32>
    %cst_36 = arith.constant 0.000000e+00 : f32
    %106 = vector.broadcast %cst_36 : f32 to vector<16x16xf32>
    %107 = arith.subf %106, %105 : vector<16x16xf32>
    %108 = math.exp %107 : vector<16x16xf32>
    %cst_37 = arith.constant 1.000000e+00 : f32
    %109 = vector.broadcast %cst_37 : f32 to vector<16x16xf32>
    %110 = arith.addf %109, %108 : vector<16x16xf32>
    %cst_38 = arith.constant 1.000000e+00 : f32
    %111 = vector.broadcast %cst_38 : f32 to vector<16x16xf32>
    %112 = arith.divf %111, %110 : vector<16x16xf32>
    %c0_39 = arith.constant 0 : index
    %c0_40 = arith.constant 0 : index
    %c0_41 = arith.constant 0 : index
    %c0_42 = arith.constant 0 : index
    %113 = vector.load %arg5[%c0_39, %c0_40, %c0_41, %c0_42] : memref<1x4x16x16xf32, #tpu.memory_space<vmem>>, vector<1x1x16x16xf32>
    %114 = vector.shape_cast %113 : vector<1x1x16x16xf32> to vector<16x16xf32>
    %115 = vector.shape_cast %112 : vector<16x16xf32> to vector<1x1x16x16xf32>
    tpu.vector_store %arg5[%c0_39, %c0_40, %c0_41, %c0_42], %115 {strides = array<i32>} : memref<1x4x16x16xf32, #tpu.memory_space<vmem>>, vector<1x1x16x16xf32>,
    %cst_43 = arith.constant 0.000000e+00 : f32
    %116 = vector.broadcast %cst_43 : f32 to vector<16x16xf32>
    %c1_44 = arith.constant 1 : index
    %c0_45 = arith.constant 0 : index
    %117 = memref.load %arg4[%c1_44, %c0_45] : memref<4x4xf32, #tpu.memory_space<smem>>
    %118 = vector.broadcast %117 : f32 to vector<16x16xf32>
    %119 = arith.mulf %118, %79 : vector<16x16xf32>
    %120 = arith.addf %116, %119 : vector<16x16xf32>
    %c1_46 = arith.constant 1 : index
    %c1_47 = arith.constant 1 : index
    %121 = memref.load %arg4[%c1_46, %c1_47] : memref<4x4xf32, #tpu.memory_space<smem>>
    %122 = vector.broadcast %121 : f32 to vector<16x16xf32>
    %123 = arith.mulf %122, %82 : vector<16x16xf32>
    %124 = arith.addf %120, %123 : vector<16x16xf32>
    %c1_48 = arith.constant 1 : index
    %c2_49 = arith.constant 2 : index
    %125 = memref.load %arg4[%c1_48, %c2_49] : memref<4x4xf32, #tpu.memory_space<smem>>
    %126 = vector.broadcast %125 : f32 to vector<16x16xf32>
    %127 = arith.mulf %126, %85 : vector<16x16xf32>
    %128 = arith.addf %124, %127 : vector<16x16xf32>
    %c1_50 = arith.constant 1 : index
    %c3_51 = arith.constant 3 : index
    %129 = memref.load %arg4[%c1_50, %c3_51] : memref<4x4xf32, #tpu.memory_space<smem>>
    %130 = vector.broadcast %129 : f32 to vector<16x16xf32>
    %131 = arith.mulf %130, %88 : vector<16x16xf32>
    %132 = arith.addf %128, %131 : vector<16x16xf32>
    %cst_52 = arith.constant 0.000000e+00 : f32
    %133 = vector.broadcast %cst_52 : f32 to vector<16x16xf32>
    %134 = arith.subf %133, %132 : vector<16x16xf32>
    %135 = math.exp %134 : vector<16x16xf32>
    %cst_53 = arith.constant 1.000000e+00 : f32
    %136 = vector.broadcast %cst_53 : f32 to vector<16x16xf32>
    %137 = arith.addf %136, %135 : vector<16x16xf32>
    %cst_54 = arith.constant 1.000000e+00 : f32
    %138 = vector.broadcast %cst_54 : f32 to vector<16x16xf32>
    %139 = arith.divf %138, %137 : vector<16x16xf32>
    %c0_55 = arith.constant 0 : index
    %c1_56 = arith.constant 1 : index
    %c0_57 = arith.constant 0 : index
    %c0_58 = arith.constant 0 : index
    %140 = vector.load %arg5[%c0_55, %c1_56, %c0_57, %c0_58] : memref<1x4x16x16xf32, #tpu.memory_space<vmem>>, vector<1x1x16x16xf32>
    %141 = vector.shape_cast %140 : vector<1x1x16x16xf32> to vector<16x16xf32>
    %142 = vector.shape_cast %139 : vector<16x16xf32> to vector<1x1x16x16xf32>
    tpu.vector_store %arg5[%c0_55, %c1_56, %c0_57, %c0_58], %142 {strides = array<i32>} : memref<1x4x16x16xf32, #tpu.memory_space<vmem>>, vector<1x1x16x16xf32>,
    %cst_59 = arith.constant 0.000000e+00 : f32
    %143 = vector.broadcast %cst_59 : f32 to vector<16x16xf32>
    %c2_60 = arith.constant 2 : index
    %c0_61 = arith.constant 0 : index
    %144 = memref.load %arg4[%c2_60, %c0_61] : memref<4x4xf32, #tpu.memory_space<smem>>
    %145 = vector.broadcast %144 : f32 to vector<16x16xf32>
    %146 = arith.mulf %145, %79 : vector<16x16xf32>
    %147 = arith.addf %143, %146 : vector<16x16xf32>
    %c2_62 = arith.constant 2 : index
    %c1_63 = arith.constant 1 : index
    %148 = memref.load %arg4[%c2_62, %c1_63] : memref<4x4xf32, #tpu.memory_space<smem>>
    %149 = vector.broadcast %148 : f32 to vector<16x16xf32>
    %150 = arith.mulf %149, %82 : vector<16x16xf32>
    %151 = arith.addf %147, %150 : vector<16x16xf32>
    %c2_64 = arith.constant 2 : index
    %c2_65 = arith.constant 2 : index
    %152 = memref.load %arg4[%c2_64, %c2_65] : memref<4x4xf32, #tpu.memory_space<smem>>
    %153 = vector.broadcast %152 : f32 to vector<16x16xf32>
    %154 = arith.mulf %153, %85 : vector<16x16xf32>
    %155 = arith.addf %151, %154 : vector<16x16xf32>
    %c2_66 = arith.constant 2 : index
    %c3_67 = arith.constant 3 : index
    %156 = memref.load %arg4[%c2_66, %c3_67] : memref<4x4xf32, #tpu.memory_space<smem>>
    %157 = vector.broadcast %156 : f32 to vector<16x16xf32>
    %158 = arith.mulf %157, %88 : vector<16x16xf32>
    %159 = arith.addf %155, %158 : vector<16x16xf32>
    %cst_68 = arith.constant 0.000000e+00 : f32
    %160 = vector.broadcast %cst_68 : f32 to vector<16x16xf32>
    %161 = arith.subf %160, %159 : vector<16x16xf32>
    %162 = math.exp %161 : vector<16x16xf32>
    %cst_69 = arith.constant 1.000000e+00 : f32
    %163 = vector.broadcast %cst_69 : f32 to vector<16x16xf32>
    %164 = arith.addf %163, %162 : vector<16x16xf32>
    %cst_70 = arith.constant 1.000000e+00 : f32
    %165 = vector.broadcast %cst_70 : f32 to vector<16x16xf32>
    %166 = arith.divf %165, %164 : vector<16x16xf32>
    %c0_71 = arith.constant 0 : index
    %c2_72 = arith.constant 2 : index
    %c0_73 = arith.constant 0 : index
    %c0_74 = arith.constant 0 : index
    %167 = vector.load %arg5[%c0_71, %c2_72, %c0_73, %c0_74] : memref<1x4x16x16xf32, #tpu.memory_space<vmem>>, vector<1x1x16x16xf32>
    %168 = vector.shape_cast %167 : vector<1x1x16x16xf32> to vector<16x16xf32>
    %169 = vector.shape_cast %166 : vector<16x16xf32> to vector<1x1x16x16xf32>
    tpu.vector_store %arg5[%c0_71, %c2_72, %c0_73, %c0_74], %169 {strides = array<i32>} : memref<1x4x16x16xf32, #tpu.memory_space<vmem>>, vector<1x1x16x16xf32>,
    %cst_75 = arith.constant 0.000000e+00 : f32
    %170 = vector.broadcast %cst_75 : f32 to vector<16x16xf32>
    %c3_76 = arith.constant 3 : index
    %c0_77 = arith.constant 0 : index
    %171 = memref.load %arg4[%c3_76, %c0_77] : memref<4x4xf32, #tpu.memory_space<smem>>
    %172 = vector.broadcast %171 : f32 to vector<16x16xf32>
    %173 = arith.mulf %172, %79 : vector<16x16xf32>
    %174 = arith.addf %170, %173 : vector<16x16xf32>
    %c3_78 = arith.constant 3 : index
    %c1_79 = arith.constant 1 : index
    %175 = memref.load %arg4[%c3_78, %c1_79] : memref<4x4xf32, #tpu.memory_space<smem>>
    %176 = vector.broadcast %175 : f32 to vector<16x16xf32>
    %177 = arith.mulf %176, %82 : vector<16x16xf32>
    %178 = arith.addf %174, %177 : vector<16x16xf32>
    %c3_80 = arith.constant 3 : index
    %c2_81 = arith.constant 2 : index
    %179 = memref.load %arg4[%c3_80, %c2_81] : memref<4x4xf32, #tpu.memory_space<smem>>
    %180 = vector.broadcast %179 : f32 to vector<16x16xf32>
    %181 = arith.mulf %180, %85 : vector<16x16xf32>
    %182 = arith.addf %178, %181 : vector<16x16xf32>
    %c3_82 = arith.constant 3 : index
    %c3_83 = arith.constant 3 : index
    %183 = memref.load %arg4[%c3_82, %c3_83] : memref<4x4xf32, #tpu.memory_space<smem>>
    %184 = vector.broadcast %183 : f32 to vector<16x16xf32>
    %185 = arith.mulf %184, %88 : vector<16x16xf32>
    %186 = arith.addf %182, %185 : vector<16x16xf32>
    %cst_84 = arith.constant 0.000000e+00 : f32
    %187 = vector.broadcast %cst_84 : f32 to vector<16x16xf32>
    %188 = arith.subf %187, %186 : vector<16x16xf32>
    %189 = math.exp %188 : vector<16x16xf32>
    %cst_85 = arith.constant 1.000000e+00 : f32
    %190 = vector.broadcast %cst_85 : f32 to vector<16x16xf32>
    %191 = arith.addf %190, %189 : vector<16x16xf32>
    %cst_86 = arith.constant 1.000000e+00 : f32
    %192 = vector.broadcast %cst_86 : f32 to vector<16x16xf32>
    %193 = arith.divf %192, %191 : vector<16x16xf32>
    %c0_87 = arith.constant 0 : index
    %c3_88 = arith.constant 3 : index
    %c0_89 = arith.constant 0 : index
    %c0_90 = arith.constant 0 : index
    %194 = vector.load %arg5[%c0_87, %c3_88, %c0_89, %c0_90] : memref<1x4x16x16xf32, #tpu.memory_space<vmem>>, vector<1x1x16x16xf32>
    %195 = vector.shape_cast %194 : vector<1x1x16x16xf32> to vector<16x16xf32>
    %196 = vector.shape_cast %193 : vector<16x16xf32> to vector<1x1x16x16xf32>
    tpu.vector_store %arg5[%c0_87, %c3_88, %c0_89, %c0_90], %196 {strides = array<i32>} : memref<1x4x16x16xf32, #tpu.memory_space<vmem>>, vector<1x1x16x16xf32>,
    return
  }
  func.func @transform_0(%arg0: i32) -> (i32, i32, i32, i32) {
    %c0_i32 = arith.constant 0 : i32
    %c0_i32_0 = arith.constant 0 : i32
    %c0_i32_1 = arith.constant 0 : i32
    %c0_i32_2 = arith.constant 0 : i32
    return %arg0, %c0_i32, %c0_i32_0, %c0_i32_1 : i32, i32, i32, i32
  }
  func.func @transform_1(%arg0: i32) -> (i32, i32) {
    %c0_i32 = arith.constant 0 : i32
    %c0_i32_0 = arith.constant 0 : i32
    %c0_i32_1 = arith.constant 0 : i32
    return %c0_i32, %c0_i32_0 : i32, i32
  }
  func.func @transform_2(%arg0: i32) -> (i32, i32) {
    %c0_i32 = arith.constant 0 : i32
    %c0_i32_0 = arith.constant 0 : i32
    %c0_i32_1 = arith.constant 0 : i32
    return %c0_i32, %c0_i32_0 : i32, i32
  }
  func.func @transform_3(%arg0: i32) -> (i32, i32) {
    %c0_i32 = arith.constant 0 : i32
    %c0_i32_0 = arith.constant 0 : i32
    %c0_i32_1 = arith.constant 0 : i32
    return %c0_i32, %c0_i32_0 : i32, i32
  }
  func.func @transform_4(%arg0: i32) -> (i32, i32, i32, i32) {
    %c0_i32 = arith.constant 0 : i32
    %c0_i32_0 = arith.constant 0 : i32
    %c0_i32_1 = arith.constant 0 : i32
    %c0_i32_2 = arith.constant 0 : i32
    return %arg0, %c0_i32, %c0_i32_0, %c0_i32_1 : i32, i32, i32, i32
  }
}

</mosaic_0001>

<bundles_post_ra>
// kernel: scale_spatial_attention.1
= control target key start
LH: loop header
LB: loop body
LE: loop exit
PB: predicated region body
PF: predicated region fallthrough
CT: control target
= control target key end

     0   :  { %s1676_s0 = inlined_call_operand.hbm [shape: f32[2,4,16,16], index: 0, kind: input, shape index: {}]   ;;  %s1677_s1 = inlined_call_operand.vmem [shape: f32[3,3], index: 1, kind: input, shape index: {}]   ;;  %s1678_s2 = inlined_call_operand.<no memory space> [shape: f32[1,1], index: 2, kind: input, shape index: {}]   ;;  %s1679_s3 = inlined_call_operand.vmem [shape: f32[4,4], index: 3, kind: input, shape index: {}]   ;;  %s1680_s4 = inlined_call_operand.hbm [shape: f32[2,4,16,16], index: 4, kind: output, shape index: {}]  }
   0x1   :  { %1681 = sst [smem:[#allocation15_spill]] %s1677_s1 }
   0x2   :  { %9 = sst [smem:[#allocation2]] %s1678_s2 }
   0x3   :  { %10 = vsyncpa [#allocation4], 0 }
   0x4   :  { %12 = vsyncpa [#allocation4 + $0x1], 0 }
   0x5   :  { %13 = vsyncpa [#allocation6], 0 }
   0x6   :  { %14 = vsyncpa [#allocation9], 0 }
   0x7   :  { %15 = vsyncpa [#allocation5], 0 }
   0x8   :  { %17 = vsyncpa [#allocation5 + $0x1], 0  ;;  %s1204_s17 = smov 0   ;;  %s1206_s18 = smov 0  }
   0x9   :  { %s1208_s19 = smov 0   ;;  %s1210_s20 = smov 0  }
   0xa LB: > { %s1225_s2 = sadd.s32 4294967295, %s1165_s20   ;;  %s868_s21 = sadd.s32 4294967294, %s1165_s20   ;;  %s1165_s20 = sphi %s1210_s20, %s1704_s20   ;;  %s1161_s19 = sphi %s1208_s19, %s1703_s19   ;;  %s1157_s18 = sphi %s1206_s18, %s1702_s18   ;;  %s1153_s17 = sphi %s1204_s17, %s1701_s17  }
   0xb   : > { %s1229_s22 = sadd.s32 1, %s1165_s20   ;;  %s30_s23 = sadd.s32 1, %s1161_s19 }
   0xc   : > { %s27_s24 = ssub.s32 %s1165_s20, %s1229_s22  ;;  %p37_p0 = scmp.ne.s32.totalorder %s1161_s19, %s1157_s18 }
   0xd   : > { %p28_p1 = scmp.eq.s32.totalorder %s27_s24, 0  ;;  %p38_p2 = scmp.eq.s32.totalorder %s1165_s20, 0 }
   0xe   : > { %p43_p3 = scmp.ne.s32.totalorder %s1157_s18, %s1153_s17  ;;  %p44_p4 = scmp.eq.s32.totalorder %s1225_s2, 0 }
   0xf   : > { %s1241_s25 = scalar_select %p28_p1, %s1161_s19, %s30_s23  }
  0x10   : > { %p1243_p5 = por %p38_p2, %p37_p0  ;;  %p1249_p6 = por %p44_p4, %p43_p3 }
  0x11   : > { %p130_p7 = scmp.eq.s32.totalorder %s1225_s2, 1  ;;  %p136_p8 = scmp.eq.s32.totalorder %s868_s21, 1 }
  0x12   : > { %p869_p9 = scmp.ge.s32.totalorder %s1165_s20, 1  ;;  %p143_p10 = scmp.lt.s32.totalorder %s1165_s20, 3 }
  0x13   : > { %p1256_p11 = por %p130_p7, %p37_p0  ;;  %p1260_p12 = por %p136_p8, %p43_p3 }
  0x14   : > { %p1264_p13 = pnand %p869_p9, %p143_p10  ;;  %s1687_s1 = sld [smem:[#allocation15_spill]] }
  0x15   : > { %p946_p2 = scmp.lt.s32.totalorder %s1165_s20, 2  ;;  %s168_s10 = sshll.u32 %s1679_s3, 4  ;;  %s169_s10 = int_to_ptr.vmem [resolvable:$true] %s168_s10 }
  0x16   : > { %p929_p1 = pneg %p1264_p13  ;;  %s1167_s12 = smov [#allocation7]  }
  0x17   : > { %p1282_p7 = pnand %p946_p2, %p1243_p5  ;;  %s179_s13 = sand.u32 1, %s1161_s19  }
  0x18   : > { %p930_p3 = pnand %p929_p1, %p44_p4  ;;  %s1168_s14 = smov [#allocation8]  }
  0x19   : > { %s873_s15 = sshll.u32 %s179_s13, 6  ;;  %s915_s16 = sshll.u32 %s1165_s20, 6 }
  0x1a   : > { %s155_s7 = sshll.u32 %s1687_s1, 4  ;;  %s188_s24 = scalar_lea.hbm %s1676_s0, %s915_s16  ;;  %s156_s7 = int_to_ptr.vmem [resolvable:$true] %s155_s7 }
  0x1b   : > { %932 = dma.vmem_to_smem (!%p930_p3), %s156_s7, 64, %s1167_s12, [#allocation6]  }
  0x1c   : > { %935 = dma.vmem_to_smem (!%p930_p3), %s169_s10, 64, %s1168_s14, [#allocation9]  }
  0x1d   : > { %s183_s5 = scalar_lea.vmem [#allocation3], %s873_s15  ;;  %s189_s26 = sshll.u32 %s188_s24, 4  ;;  %s190_s26 = int_to_ptr.hbm [resolvable:$true] %s189_s26 }
  0x1e   : > { %s191_s6 = sshll.u32 %s183_s5, 4  ;;  %s180_s8 = scalar_lea.sflag [#allocation4], %s179_s13  ;;  %s192_s6 = int_to_ptr.vmem [resolvable:$true] %s191_s6 }
  0x1f   : > { %s1061_s9 = sshra.s32 %s190_s26, 4  ;;  %p1065_p8 = pneg %p1282_p7  ;;  %s1062_s9 = int_to_ptr.hbm [resolvable:$true] %s1061_s9 }
  0x20   : > { %s1063_s1 = scalar_lea.hbm %s1062_s9, 64  ;;  %s1068_s12 = scalar_lea.hbm %s1676_s0, 128 }
  0x21   : > { %p1064_p5 = scmp.ne.s32.totalorder %s1062_s9, %s1063_s1  ;;  %p1069_p1 = scmp.lt.s32.totalorder %s1062_s9, %s1676_s0 }
  0x22   : > { %p1070_p2 = scmp.lt.s32.totalorder %s1068_s12, %s1063_s1 }
  0x23   : > { %p1066_p9 = pnand %p1065_p8, %p1064_p5 }
  0x24   : > { %p1071_p3 = por %p1070_p2, %p1069_p1 }
  0x25   : > { %p1067_p10 = pneg %p1066_p9 }
  0x27   : > { %p1072_p0 = pnand %p1071_p3, %p1067_p10 }
  0x29   : > { %1075 = shalt.err (!%p1072_p0)
}
  0x2a   : > { %s1169_s13 = smov 128   ;;  %s1170_s15 = smov 8  }
  0x2b   : > { %939 = dma.hbm_to_vmem [thread:$0]  (!%p1282_p7), %s190_s26, 1024, %s192_s6, %s180_s8, %s1169_s13, %s1169_s13, %s1170_s15  }
  0x2c   : > { %203 = sbr.rel (%p1264_p13) target bundleno = 425 (0x1a9), region = 36  ;;  %s1304_s21 = sand.u32 (!%p1264_p13), 1, %s1157_s18  }
  0x2d   : > { %s877_s23 = sshll.u32 (!%p1264_p13), %s1304_s21, 6  ;;  %s206_s1 = scalar_lea.sflag (!%p1264_p13), [#allocation4], %s1304_s21 }
  0x2e   : > { %s209_s24 = scalar_lea.vmem (!%p1264_p13), [#allocation3], %s877_s23 }
  0x31   : > { %1136 = dma.done.wait (%p1249_p6), %s206_s1, 1024  }
  0x32   : > { %1138 = vsyncadd (%p1249_p6), %s206_s1, 4294966272 }
  0x33   : > { %1140 = dma.done.wait (%p44_p4), [#allocation6], 64  }
  0x34   : > { %1142 = vsyncadd (%p44_p4), [#allocation6], 4294967232 }
  0x35   : > { %1144 = dma.done.wait (%p44_p4), [#allocation9], 64  }
  0x36   : > { %1146 = vsyncadd (%p44_p4), [#allocation9], 4294967232 }
  0x37   : > { %225 = sfence }
  0x38   : > { %v1322_v0 = vld [vmem:[%s209_s24] sm:$0xff]  ;;  %v1324_v1 = vld [vmem:[%s209_s24 + $0x10] sm:$0xff]  ;;  %v1330_v4 = vld [vmem:[%s209_s24 + $0x8] sm:$0xff]  ;;  %vm264_vm0 = vcmask 1040384   ;;  %s1171_s27 = smov 1   ;;  %s1346_s30 = sld [smem:[#allocation7 + $0x1]] }
  0x39   : > { %v1326_v2 = vld [vmem:[%s209_s24 + $0x20] sm:$0xff]  ;;  %v254_v3 = vadd.f32 %v1324_v1, %v1322_v0  ;;  %v1332_v5 = vld [vmem:[%s209_s24 + $0x18] sm:$0xff]  ;;  %v1334_v6 = vld [vmem:[%s209_s24 + $0x30] sm:$0xff]  ;;  %s884_s11 = sld [smem:[#allocation7 + $0x81]]  ;;  %vm283_vm1 = vcmask 7168   ;;  %vm287_vm2 = vcmask 138240  }
  0x3a   : > { %v1336_v7 = vld [vmem:[%s209_s24 + $0x28] sm:$0xff]  ;;  %v255_v8 = vadd.f32 %v1332_v5, %v1330_v4  ;;  %v1341_v10 = vld [vmem:[%s209_s24 + $0x38] sm:$0xff]  ;;  %s883_s5 = sld [smem:[#allocation7 + $0x80]]  ;;  %s1172_s9 = smov 127   ;;  %vm333_vm3 = vcmask 1046528   ;;  %vm393_vm4 = vcmask 1045504  }
  0x3b   : > { %v256_v9 = vadd.f32 %v254_v3, %v1326_v2  ;;  %s1349_s6 = sld [smem:[#allocation7 + $0x2]]  ;;  %s1173_s10 = smov 126   ;;  %vm559_vm15 = vcmask 130048  }
  0x3c   : > { %v257_v11 = vadd.f32 %v255_v8, %v1336_v7  ;;  %s885_s26 = sld [smem:[#allocation7 + $0x82]] }
  0x3d   : > { %v258_v12 = vadd.f32 %v256_v9, %v1334_v6  ;;  %s886_s8 = sld [smem:[#allocation7 + $0x100]] }
  0x3e   : > { %v259_v13 = vadd.f32 %v257_v11, %v1341_v10  ;;  %v298_v22 = vstv %s1346_s30  ;;  %s1368_s7 = sld [smem:[#allocation7 + $0x101]] }
  0x3f   : > { %v260_v14 = vmul.f32 0.25, %v258_v12  ;;  %v344_v28 = vstv %s884_s11  ;;  %s888_s12 = sld [smem:[#allocation7 + $0x102]] }
  0x40   : > { %v261_v15 = vmul.f32 0.25, %v259_v13  ;;  %v326_v30 = vstv %s883_s5  ;;  %s291_s14 = sld [smem:[#allocation7]] }
  0x41   : > { %v265_v16 = vrot.slane %v260_v14, 7  ;;  %v312_v34 = vstv %s1349_s6  ;;  %s447_s16 = sld [smem:[#allocation2]] }
  0x42   : > { %v266_v17 = vrot.slane %v261_v15, 7  ;;  %v365_v37 = vstv %s885_s26  ;;  %s1415_s13 = sld [smem:[#allocation8]] }
  0x43   : > { %v270_v18 = vsel %vm264_vm0, 0.0, %v265_v16  ;;  %v386_v39 = vstv %s886_s8  ;;  %s1417_s15 = sld [smem:[#allocation8 + $0x1]] }
  0x44   : > { %274 = vrot.lane.b32.xlu0 %v270_v18, %s1171_s27  ;;  %v271_v19 = vsel %vm264_vm0, %v266_v17, 0.0  ;;  %v267_v20 = vsel %vm264_vm0, %v265_v16, %v266_v17  ;;  %v404_v63 = vstv %s1368_s7  ;;  %s1419_s1 = sld [smem:[#allocation8 + $0x2]] }
  0x45   : > { %278 = vrot.lane.b32.xlu1 %v271_v19, %s1171_s27  ;;  %v425_v16 = vstv %s888_s12  ;;  %s1421_s24 = sld [smem:[#allocation8 + $0x3]] }
  0x46   : > { %s1425_s30 = sld [smem:[#allocation8 + $0x81]] }
  0x47   : > { %s1427_s11 = sld [smem:[#allocation8 + $0x82]] }
  0x48   : > { %s1429_s5 = sld [smem:[#allocation8 + $0x83]] }
  0x49   : > { %s1431_s6 = sld [smem:[#allocation8 + $0x100]] }
  0x4a   : > { %s1433_s26 = sld [smem:[#allocation8 + $0x101]] }
  0x4b   : > { %s1435_s8 = sld [smem:[#allocation8 + $0x102]] }
  0x4c   : > { %276 = vrot.lane.b32.xlu0 %v267_v20, %s1171_s27  ;;  %s1423_s27 = sld [smem:[#allocation8 + $0x80]] }
  0x4d   : > { %s1439_s7 = sld [smem:[#allocation8 + $0x180]] }
  0x4e   : > { %s1447_s12 = sld [smem:[#allocation8 + $0x182]] }
  0xb6   : > { %v275_v21 = vpop.permute.xlu0 %274 }
  0xb7   : > { %v284_v23 = vsel %vm283_vm1, 0.0, %v275_v21  ;;  %v279_v24 = vpop.permute.xlu1 %278 }
  0xb8   : > { %v1353_v25 = vsel %vm287_vm2, %v284_v23, 0.0  ;;  %v286_v27 = vsel %vm283_vm1, 0.0, %v279_v24 }
  0xb9   : > { %v299_v26 = vmul.f32 %v298_v22, %v1353_v25  ;;  %v1359_v29 = vsel %vm287_vm2, %v286_v27, 0.0  ;;  %v345_v32 = vmul.f32 %v344_v28, %v1353_v25  ;;  %v327_v38 = vmul.f32 %v326_v30, %v1353_v25 }
  0xba   : > { %v329_v35 = vmul.f32 %v326_v30, %v1359_v29  ;;  %v389_v43 = vmul.f32 %v386_v39, %v1359_v29  ;;  %v387_v49 = vmul.f32 %v386_v39, %v1353_v25  ;;  %v366_v51 = vmul.f32 %v365_v37, %v1353_v25 }
  0xbb   : > { %303 = vrot.lane.b32.xlu1 %v299_v26, %s1172_s9  ;;  %v351_v44 = vrot.slane %v345_v32, 1  ;;  %v368_v54 = vmul.f32 %v365_v37, %v1359_v29  ;;  %v334_v55 = vrot.slane %v327_v38, 1  ;;  %v313_v3 = vmul.f32 %v312_v34, %v1353_v25 }
  0xbc   : > { %v337_v48 = vrot.slane %v329_v35, 1  ;;  %v397_v56 = vrot.slane %v389_v43, 2  ;;  %v394_v60 = vrot.slane %v387_v49, 2  ;;  %v372_v62 = vrot.slane %v366_v51, 1 }
  0xbd   : > { %v375_v8 = vrot.slane %v368_v54, 1  ;;  %v407_v14 = vmul.f32 %v404_v63, %v1359_v29  ;;  %v347_v15 = vmul.f32 %v344_v28, %v1359_v29  ;;  %v292_v38 = vstv %s291_s14  ;;  %s1490_s14 = sld [smem:[#allocation8 + $0x183]] }
  0xbe   : > { %v277_v31 = vpop.permute.xlu0 %276 }
  0xbf   : > { %v285_v33 = vsel %vm283_vm1, 0.0, %v277_v31  ;;  %v414_v20 = vrot.slane %v407_v14, 2  ;;  %v354_v21 = vrot.slane %v347_v15, 1 }
  0xc0   : > { %v1366_v36 = vsel %vm287_vm2, %v285_v33, 0.0  ;;  %v428_v33 = vmul.f32 %v425_v16, %v1359_v29 }
  0xc1   : > { %v314_v40 = vmul.f32 %v312_v34, %v1366_v36  ;;  %v300_v41 = vmul.f32 %v298_v22, %v1366_v36  ;;  %v346_v42 = vmul.f32 %v344_v28, %v1366_v36  ;;  %v367_v45 = vmul.f32 %v365_v37, %v1366_v36 }
  0xc2   : > { %v328_v46 = vmul.f32 %v326_v30, %v1366_v36  ;;  %v388_v50 = vmul.f32 %v386_v39, %v1366_v36  ;;  %v406_v13 = vmul.f32 %v404_v63, %v1366_v36  ;;  %v427_v18 = vmul.f32 %v425_v16, %v1366_v36 }
  0xc3   : > { %319 = vrot.lane.b32.xlu0 %v314_v40, %s1173_s10  ;;  %305 = vrot.lane.b32.xlu2 %v300_v41, %s1172_s9  ;;  %v352_v47 = vrot.slane %v346_v42, 1  ;;  %v373_v57 = vrot.slane %v367_v45, 1  ;;  %v426_v22 = vmul.f32 %v425_v16, %v1353_v25  ;;  %v405_v28 = vmul.f32 %v404_v63, %v1353_v25 }
  0xc4   : > { %v335_v52 = vrot.slane %v328_v46, 1  ;;  %v395_v61 = vrot.slane %v388_v50, 2  ;;  %v412_v19 = vrot.slane %v406_v13, 2  ;;  %v433_v23 = vrot.slane %v427_v18, 2 }
  0xc5   : > { %v353_v53 = vsel %vm333_vm3, %v351_v44, %v352_v47  ;;  %v374_v12 = vsel %vm333_vm3, %v372_v62, %v373_v57  ;;  %v376_v17 = vsel %vm333_vm3, %v373_v57, %v375_v8  ;;  %v355_v26 = vsel %vm333_vm3, %v352_v47, %v354_v21 }
  0xc6   : > { %356 = vrot.lane.b32.xlu1 %v353_v53, %s1172_s9  ;;  %v338_v58 = vsel %vm333_vm3, %v335_v52, %v337_v48  ;;  %v336_v59 = vsel %vm333_vm3, %v334_v55, %v335_v52  ;;  %v396_v9 = vsel %vm393_vm4, %v394_v60, %v395_v61  ;;  %v398_v11 = vsel %vm393_vm4, %v395_v61, %v397_v56 }
  0xc7   : > { %v415_v24 = vsel %vm393_vm4, %v412_v19, %v414_v20  ;;  %v432_v27 = vrot.slane %v426_v22, 2  ;;  %v411_v31 = vrot.slane %v405_v28, 2  ;;  %v435_v34 = vrot.slane %v428_v33, 2 }
  0xc8   : > { %v293_v40 = vmul.f32 %v292_v38, %v1353_v25  ;;  %v294_v44 = vmul.f32 %v292_v38, %v1366_v36  ;;  %v448_v8 = vstv %s447_s16  ;;  %v510_v28 = vstv %s1419_s1  ;;  %s1593_s16 = scalar_lea.vmem [#allocation10], %s877_s23  ;;  %s916_s23 = sshll.u32 %s1225_s2, 6 }
  0xc9   : > { %v434_v30 = vsel %vm393_vm4, %v432_v27, %v433_v23  ;;  %v413_v32 = vsel %vm393_vm4, %v411_v31, %v412_v19  ;;  %v436_v35 = vsel %vm393_vm4, %v433_v23, %v435_v34  ;;  %v504_v27 = vstv %s1417_s15  ;;  %s769_s2 = scalar_lea.hbm %s1680_s4, %s916_s23  ;;  %s770_s1 = sshll.u32 %s1593_s16, 4  ;;  %s771_s1 = int_to_ptr.vmem [resolvable:$true] %s770_s1 }
  0xca   : > { %v569_v33 = vstv %s1425_s30  ;;  %v575_v34 = vstv %s1427_s11  ;;  %v628_v38 = vstv %s1431_s6 }
  0xcb   : > { %377 = vrot.lane.b32.xlu0 %v374_v12, %s1173_s10  ;;  %317 = vrot.lane.b32.xlu2 %v313_v3, %s1173_s10 }
  0xce   : > { %379 = vrot.lane.b32.xlu1 %v376_v17, %s1173_s10 }
  0xd3   : > { %418 = vrot.lane.b32.xlu0 %v415_v24, %s1172_s9  ;;  %358 = vrot.lane.b32.xlu2 %v355_v26, %s1172_s9  ;;  %v498_v24 = vstv %s1415_s13 }
  0xd6   : > { %437 = vrot.lane.b32.xlu1 %v434_v30, %s1173_s10  ;;  %v516_v30 = vstv %s1421_s24  ;;  %s772_s24 = sshll.u32 %s769_s2, 4  ;;  %s773_s24 = int_to_ptr.hbm [resolvable:$true] %s772_s24 }
  0xd7   : > { %s1105_s30 = sshra.s32 %s773_s24, 4  ;;  %s1106_s30 = int_to_ptr.hbm [resolvable:$true] %s1105_s30 }
  0xd8   : > { %s1107_s11 = scalar_lea.hbm %s1106_s30, 64  ;;  %p1112_p0 = scmp.lt.s32.totalorder %s1106_s30, %s1680_s4 }
  0xd9   : > { %p1108_p4 = scmp.ne.s32.totalorder %s1106_s30, %s1107_s11 }
  0xdb   : > { %416 = vrot.lane.b32.xlu2 %v413_v32, %s1172_s9  ;;  %s1437_s9 = sld [smem:[#allocation8 + $0x103]]  ;;  %v563_v32 = vstv %s1423_s27  ;;  %s758_s27 = scalar_lea.sflag [#allocation5], %s1304_s21 }
  0xdc   : > { %p1109_p6 = pnand %p1108_p4, %p1256_p11 }
  0xde   : > { %p1110_p13 = pneg %p1109_p6 }
  0xe3   : > { %439 = vrot.lane.b32.xlu2 %v436_v35, %s1173_s10  ;;  %s1442_s10 = sld [smem:[#allocation8 + $0x181]] }
 0x11d   : > { %v306_v37 = vpop.permute.xlu2 %305 }
 0x11e   : > { %v310_v46 = vadd.f32 %v306_v37, %v294_v44  ;;  %v581_v37 = vstv %s1429_s5  ;;  %v634_v44 = vstv %s1433_s26  ;;  %s1111_s26 = scalar_lea.hbm %s1680_s4, 128 }
 0x11f   : > { %p1113_p7 = scmp.lt.s32.totalorder %s1111_s26, %s1107_s11 }
 0x121   : > { %p1114_p5 = por %p1113_p7, %p1112_p0 }
 0x123   : > { %p1115_p8 = pnand %p1114_p5, %p1110_p13 }
 0x125   : > { %v318_v39 = vpop.permute.xlu2 %317 }
 0x12d   : > { %v304_v41 = vpop.permute.xlu1 %303  ;;  %v359_v29 = vpop.permute.xlu2 %358 }
 0x12e   : > { %v309_v42 = vadd.f32 %v304_v41, %v293_v40 }
 0x130   : > { %v323_v43 = vadd.f32 %v318_v39, %v309_v42 }
 0x132   : > { %v341_v45 = vadd.f32 %v336_v59, %v323_v43 }
 0x135   : > { %v320_v47 = vpop.permute.xlu0 %319  ;;  %v417_v52 = vpop.permute.xlu2 %416 }
 0x136   : > { %v324_v48 = vadd.f32 %v320_v47, %v310_v46  ;;  %v640_v46 = vstv %s1435_s8  ;;  %v646_v47 = vstv %s1437_s9 }
 0x138   : > { %v342_v49 = vadd.f32 %v338_v58, %v324_v48  ;;  %v357_v50 = vpop.permute.xlu1 %356 }
 0x139   : > { %v362_v51 = vadd.f32 %v357_v50, %v341_v45 }
 0x13a   : > { %v363_v55 = vadd.f32 %v359_v29, %v342_v49  ;;  %v693_v49 = vstv %s1439_s7 }
 0x13d   : > { %v378_v53 = vpop.permute.xlu0 %377  ;;  %v440_v36 = vpop.permute.xlu2 %439 }
 0x13e   : > { %v383_v54 = vadd.f32 %v378_v53, %v362_v51 }
 0x140   : > { %v401_v56 = vadd.f32 %v396_v9, %v383_v54  ;;  %v380_v57 = vpop.permute.xlu1 %379 }
 0x141   : > { %v384_v25 = vadd.f32 %v380_v57, %v363_v55  ;;  %v705_v55 = vstv %s1447_s12 }
 0x142   : > { %v422_v59 = vadd.f32 %v417_v52, %v401_v56  ;;  %v699_v52 = vstv %s1442_s10 }
 0x143   : > { %v402_v60 = vadd.f32 %v398_v11, %v384_v25 }
 0x145   : > { %v419_v61 = vpop.permute.xlu0 %418 }
 0x146   : > { %v423_v62 = vadd.f32 %v419_v61, %v402_v60 }
 0x148   : > { %v444_v63 = vadd.f32 %v440_v36, %v423_v62  ;;  %v438_v3 = vpop.permute.xlu1 %437 }
 0x149   : > { %v443_v12 = vadd.f32 %v438_v3, %v422_v59 }
 0x14a   : > { %v446_v58 = vmax.f32 %v444_v63, 0.0 }
 0x14b   : > { %v445_v13 = vmax.f32 %v443_v12, 0.0 }
 0x14c   : > { %v450_v14 = vmul.f32 %v448_v8, %v446_v58 }
 0x14d   : > { %v449_v15 = vmul.f32 %v448_v8, %v445_v13 }
 0x14e   : > { %v452_v16 = vsub.f32 0.0, %v450_v14 }
 0x14f   : > { %v451_v17 = vsub.f32 0.0, %v449_v15 }
 0x150   : > { %v455_v18 = vmul.f32 1.442695, %v452_v16 }
 0x151   : > { %v453_v9 = vmul.f32 1.442695, %v451_v17 }
 0x152   : > { %991 = vpow2.f32 %v455_v18 }
 0x153   : > { %993 = vpow2.f32 %v453_v9 }
 0x158   : > { %v992_v11 = vpop.eup %991 }
 0x159   : > { %v994_v19 = vpop.eup %993  ;;  %v458_v20 = vadd.f32 1.0, %v992_v11 }
 0x15a   : > { %v457_v21 = vadd.f32 1.0, %v994_v19 }
 0x15b   : > { %995 = vrcp.f32 %v458_v20  ;;  %v485_v40 = vand.u32 2147483648, %v458_v20  ;;  %v483_v43 = vand.u32 2147483647, %v458_v20  ;;  %vm479_vm7 = vweird.f32 %v458_v20 }
 0x15c   : > { %997 = vrcp.f32 %v457_v21  ;;  %v470_v41 = vand.u32 2147483648, %v457_v21  ;;  %v468_v29 = vand.u32 2147483647, %v457_v21  ;;  %vm464_vm8 = vweird.f32 %v457_v21 }
 0x15d   : > { %v486_v51 = vor.u32 1.1754944e-38, %v485_v40  ;;  %vm484_vm11 = vcmp.eq.f32.partialorder %v483_v43, 8.507059e+37 }
 0x15e   : > { %v471_v53 = vor.u32 1.1754944e-38, %v470_v41  ;;  %vm469_vm12 = vcmp.eq.f32.partialorder %v468_v29, 8.507059e+37 }
 0x161   : > { %v996_v22 = vpop.eup %995 }
 0x162   : > { %v998_v23 = vpop.eup %997  ;;  %v475_v26 = vmul.f32 %v996_v22, %v458_v20  ;;  %vm480_vm5 = vweird.f32 %v996_v22 }
 0x163   : > { %v460_v31 = vmul.f32 %v998_v23, %v457_v21  ;;  %vm465_vm6 = vweird.f32 %v998_v23  ;;  %vm481_vm9 = vmor %vm479_vm7, %vm480_vm5 }
 0x164   : > { %v476_v35 = vsub.f32 1.0, %v475_v26  ;;  %vm466_vm10 = vmor %vm464_vm8, %vm465_vm6 }
 0x165   : > { %v461_v39 = vsub.f32 1.0, %v460_v31 }
 0x166   : > { %v477_v42 = vmul.f32 %v996_v22, %v476_v35 }
 0x167   : > { %v462_v45 = vmul.f32 %v998_v23, %v461_v39 }
 0x168   : > { %v478_v48 = vadd.f32 %v996_v22, %v477_v42 }
 0x169   : > { %v463_v50 = vadd.f32 %v998_v23, %v462_v45 }
 0x16a   : > { %v482_v54 = vsel %vm481_vm9, %v996_v22, %v478_v48 }
 0x16b   : > { %v467_v56 = vsel %vm466_vm10, %v998_v23, %v463_v50  ;;  %v487_v57 = vsel %vm484_vm11, %v486_v51, %v482_v54 }
 0x16c   : > { %v472_v25 = vsel %vm469_vm12, %v471_v53, %v467_v56  ;;  %v490_v60 = vadd.f32 %v487_v57, %v1330_v4  ;;  %v1462_v61 = vadd.f32 %v487_v57, %v1332_v5  ;;  %v1465_v62 = vadd.f32 %v487_v57, %v1336_v7 }
 0x16d   : > { %v489_v36 = vadd.f32 %v472_v25, %v1322_v0  ;;  %v491_v59 = vadd.f32 %v472_v25, %v1324_v1  ;;  %v1470_v63 = vadd.f32 %v472_v25, %v1326_v2  ;;  %v1473_v3 = vadd.f32 %v472_v25, %v1334_v6 }
 0x16e   : > { %v1476_v8 = vadd.f32 %v487_v57, %v1341_v10  ;;  %v500_v4 = vmul.f32 %v498_v24, %v490_v60  ;;  %v506_v5 = vmul.f32 %v504_v27, %v1462_v61  ;;  %v512_v12 = vmul.f32 %v510_v28, %v1465_v62 }
 0x16f   : > { %v499_v7 = vmul.f32 %v498_v24, %v489_v36  ;;  %v505_v58 = vmul.f32 %v504_v27, %v491_v59  ;;  %v511_v0 = vmul.f32 %v510_v28, %v1470_v63  ;;  %v517_v1 = vmul.f32 %v516_v30, %v1473_v3 }
 0x170   : > { %v508_v2 = vadd.f32 %v506_v5, %v500_v4  ;;  %v518_v13 = vmul.f32 %v516_v30, %v1476_v8  ;;  %v564_v6 = vmul.f32 %v563_v32, %v489_v36  ;;  %v565_v14 = vmul.f32 %v563_v32, %v490_v60 }
 0x171   : > { %v507_v10 = vadd.f32 %v505_v58, %v499_v7  ;;  %v570_v15 = vmul.f32 %v569_v33, %v491_v59  ;;  %v571_v16 = vmul.f32 %v569_v33, %v1462_v61  ;;  %v576_v17 = vmul.f32 %v575_v34, %v1470_v63 }
 0x172   : > { %v514_v18 = vadd.f32 %v512_v12, %v508_v2  ;;  %v577_v9 = vmul.f32 %v575_v34, %v1465_v62  ;;  %v582_v11 = vmul.f32 %v581_v37, %v1473_v3  ;;  %v583_v19 = vmul.f32 %v581_v37, %v1476_v8 }
 0x173   : > { %v513_v20 = vadd.f32 %v511_v0, %v507_v10  ;;  %v572_v21 = vadd.f32 %v570_v15, %v564_v6  ;;  %v573_v22 = vadd.f32 %v571_v16, %v565_v14  ;;  %v629_v23 = vmul.f32 %v628_v38, %v489_v36 }
 0x174   : > { %v520_v24 = vadd.f32 %v518_v13, %v514_v18  ;;  %v630_v26 = vmul.f32 %v628_v38, %v490_v60  ;;  %v635_v27 = vmul.f32 %v634_v44, %v491_v59  ;;  %v636_v28 = vmul.f32 %v634_v44, %v1462_v61 }
 0x175   : > { %v519_v30 = vadd.f32 %v517_v1, %v513_v20  ;;  %v578_v31 = vadd.f32 %v576_v17, %v572_v21  ;;  %v579_v32 = vadd.f32 %v577_v9, %v573_v22  ;;  %v641_v33 = vmul.f32 %v640_v46, %v1470_v63 }
 0x176   : > { %v522_v34 = vsub.f32 0.0, %v520_v24  ;;  %v637_v35 = vadd.f32 %v635_v27, %v629_v23  ;;  %v638_v37 = vadd.f32 %v636_v28, %v630_v26  ;;  %v642_v39 = vmul.f32 %v640_v46, %v1465_v62 }
 0x177   : > { %v521_v40 = vsub.f32 0.0, %v519_v30  ;;  %v584_v41 = vadd.f32 %v582_v11, %v578_v31  ;;  %v585_v42 = vadd.f32 %v583_v19, %v579_v32  ;;  %v647_v38 = vmul.f32 %v646_v47, %v1473_v3 }
 0x178   : > { %v525_v43 = vmul.f32 1.442695, %v522_v34  ;;  %v643_v44 = vadd.f32 %v641_v33, %v637_v35  ;;  %v644_v45 = vadd.f32 %v642_v39, %v638_v37  ;;  %v648_v29 = vmul.f32 %v646_v47, %v1476_v8 }
 0x179   : > { %v523_v48 = vmul.f32 1.442695, %v521_v40  ;;  %v586_v50 = vsub.f32 0.0, %v584_v41  ;;  %v587_v51 = vsub.f32 0.0, %v585_v42  ;;  %v694_v46 = vmul.f32 %v693_v49, %v489_v36 }
 0x17a   : > { %999 = vpow2.f32 %v525_v43  ;;  %v649_v53 = vadd.f32 %v647_v38, %v643_v44  ;;  %v650_v54 = vadd.f32 %v648_v29, %v644_v45  ;;  %v695_v56 = vmul.f32 %v693_v49, %v490_v60 }
 0x17b   : > { %1001 = vpow2.f32 %v523_v48  ;;  %v588_v57 = vmul.f32 1.442695, %v586_v50  ;;  %v590_v25 = vmul.f32 1.442695, %v587_v51  ;;  %v700_v4 = vmul.f32 %v699_v52, %v491_v59 }
 0x17c   : > { %v711_v5 = vstv %s1490_s14  ;;  %v651_v47 = vsub.f32 0.0, %v649_v53  ;;  %v652_v12 = vsub.f32 0.0, %v650_v54  ;;  %v701_v7 = vmul.f32 %v699_v52, %v1462_v61 }
 0x17d   : > { %1003 = vpow2.f32 %v588_v57  ;;  %v702_v58 = vadd.f32 %v700_v4, %v694_v46  ;;  %v706_v36 = vmul.f32 %v705_v55, %v1470_v63  ;;  %v707_v0 = vmul.f32 %v705_v55, %v1465_v62 }
 0x17e   : > { %1005 = vpow2.f32 %v590_v25  ;;  %v653_v49 = vmul.f32 1.442695, %v651_v47  ;;  %v655_v60 = vmul.f32 1.442695, %v652_v12  ;;  %v703_v1 = vadd.f32 %v701_v7, %v695_v56 }
 0x17f   : > { %v708_v2 = vadd.f32 %v706_v36, %v702_v58  ;;  %v712_v59 = vmul.f32 %v711_v5, %v1473_v3  ;;  %v713_v52 = vmul.f32 %v711_v5, %v1476_v8 }
 0x180   : > { %v1000_v13 = vpop.eup %999  ;;  %1007 = vpow2.f32 %v653_v49  ;;  %v709_v6 = vadd.f32 %v707_v0, %v703_v1 }
 0x181   : > { %v1002_v61 = vpop.eup %1001  ;;  %v1521_v14 = vadd.f32 1.0, %v1000_v13  ;;  %1009 = vpow2.f32 %v655_v60  ;;  %v714_v63 = vadd.f32 %v712_v59, %v708_v2 }
 0x182   : > { %v1523_v10 = vadd.f32 1.0, %v1002_v61  ;;  %v715_v55 = vadd.f32 %v713_v52, %v709_v6 }
 0x183   : > { %v1004_v62 = vpop.eup %1003  ;;  %1011 = vrcp.f32 %v1521_v14  ;;  %v716_v15 = vsub.f32 0.0, %v714_v63  ;;  %v553_v20 = vand.u32 2147483647, %v1521_v14  ;;  %v555_v24 = vand.u32 2147483648, %v1521_v14 }
 0x184   : > { %v1006_v16 = vpop.eup %1005  ;;  %1013 = vrcp.f32 %v1523_v10  ;;  %v1527_v3 = vadd.f32 1.0, %v1004_v62  ;;  %v717_v17 = vsub.f32 0.0, %v715_v55  ;;  %v538_v11 = vand.u32 2147483647, %v1523_v10 }
 0x185   : > { %v1529_v18 = vadd.f32 1.0, %v1006_v16  ;;  %v718_v8 = vmul.f32 1.442695, %v716_v15  ;;  %v540_v19 = vand.u32 2147483648, %v1523_v10  ;;  %vm549_vm13 = vweird.f32 %v1521_v14 }
 0x186   : > { %v1008_v9 = vpop.eup %1007  ;;  %1015 = vrcp.f32 %v1527_v3  ;;  %v720_v23 = vmul.f32 1.442695, %v717_v17  ;;  %vm534_vm14 = vweird.f32 %v1523_v10  ;;  %v603_v28 = vand.u32 2147483647, %v1527_v3 }
 0x187   : > { %v1010_v21 = vpop.eup %1009  ;;  %1017 = vrcp.f32 %v1529_v18  ;;  %v1536_v22 = vadd.f32 1.0, %v1008_v9  ;;  %v605_v30 = vand.u32 2147483648, %v1527_v3  ;;  %v541_v33 = vor.u32 1.1754944e-38, %v540_v19 }
 0x188   : > { %v1539_v26 = vadd.f32 1.0, %v1010_v21  ;;  %1019 = vpow2.f32 %v718_v8  ;;  %vm1548_vm0 = vcmp.eq.f32.partialorder %v553_v20, 8.507059e+37  ;;  %v618_v35 = vand.u32 2147483647, %v1529_v18 }
 0x189   : > { %v1012_v27 = vpop.eup %1011  ;;  %1021 = vrcp.f32 %v1536_v22  ;;  %vm1554_vm1 = vcmp.eq.f32.partialorder %v538_v11, 8.507059e+37  ;;  %v556_v40 = vor.u32 1.1754944e-38, %v555_v24  ;;  %vm599_vm2 = vweird.f32 %v1527_v3 }
 0x18a   : > { %v1014_v31 = vpop.eup %1013  ;;  %v545_v32 = vmul.f32 %v1012_v27, %v1521_v14  ;;  %1023 = vrcp.f32 %v1539_v26  ;;  %vm550_vm4 = vweird.f32 %v1012_v27  ;;  %vm614_vm5 = vweird.f32 %v1529_v18 }
 0x18b   : > { %v530_v37 = vmul.f32 %v1014_v31, %v1523_v10  ;;  %1025 = vpow2.f32 %v720_v23  ;;  %vm535_vm3 = vweird.f32 %v1014_v31  ;;  %v620_v38 = vand.u32 2147483648, %v1529_v18  ;;  %vm551_vm12 = vmor %vm549_vm13, %vm550_vm4 }
 0x18c   : > { %v1016_v41 = vpop.eup %1015  ;;  %v546_v42 = vsub.f32 1.0, %v545_v32  ;;  %vm1562_vm7 = vcmp.eq.f32.partialorder %v603_v28, 8.507059e+37  ;;  %v606_v48 = vor.u32 1.1754944e-38, %v605_v30  ;;  %vm1567_vm9 = vcmp.eq.f32.partialorder %v618_v35, 8.507059e+37  ;;  %vm536_vm10 = vmor %vm534_vm14, %vm535_vm3 }
 0x18d   : > { %v1018_v43 = vpop.eup %1017  ;;  %v531_v44 = vsub.f32 1.0, %v530_v37  ;;  %v595_v45 = vmul.f32 %v1016_v41, %v1527_v3  ;;  %vm600_vm6 = vweird.f32 %v1016_v41  ;;  %v621_v54 = vor.u32 1.1754944e-38, %v620_v38 }
 0x18e   : > { %v1020_v50 = vpop.eup %1019  ;;  %v610_v51 = vmul.f32 %v1018_v43, %v1529_v18  ;;  %v547_v46 = vmul.f32 %v1012_v27, %v546_v42  ;;  %vm615_vm8 = vweird.f32 %v1018_v43  ;;  %v668_v5 = vand.u32 2147483647, %v1536_v22  ;;  %vm601_vm13 = vmor %vm599_vm2, %vm600_vm6 }
 0x18f   : > { %v1022_v56 = vpop.eup %1021  ;;  %v596_v57 = vsub.f32 1.0, %v595_v45  ;;  %v1572_v25 = vadd.f32 1.0, %v1020_v50  ;;  %v532_v4 = vmul.f32 %v1014_v31, %v531_v44  ;;  %vm616_vm14 = vmor %vm614_vm5, %vm615_vm8  ;;  %v670_v16 = vand.u32 2147483648, %v1536_v22 }
 0x190   : > { %v1024_v47 = vpop.eup %1023  ;;  %v611_v12 = vsub.f32 1.0, %v610_v51  ;;  %v660_v7 = vmul.f32 %v1022_v56, %v1536_v22  ;;  %v548_v58 = vadd.f32 %v1012_v27, %v547_v46  ;;  %vm665_vm11 = vweird.f32 %v1022_v56 }
 0x191   : > { %v1026_v36 = vpop.eup %1025  ;;  %v675_v0 = vmul.f32 %v1024_v47, %v1539_v26  ;;  %1027 = vrcp.f32 %v1572_v25  ;;  %v533_v49 = vadd.f32 %v1014_v31, %v532_v4  ;;  %v597_v60 = vmul.f32 %v1016_v41, %v596_v57 }
 0x192   : > { %v661_v1 = vsub.f32 1.0, %v660_v7  ;;  %v1581_v2 = vadd.f32 1.0, %v1026_v36  ;;  %v552_v59 = vsel %vm551_vm12, %v1012_v27, %v548_v58  ;;  %v612_v13 = vmul.f32 %v1018_v43, %v611_v12 }
 0x193   : > { %v676_v6 = vsub.f32 1.0, %v675_v0  ;;  %v537_v52 = vsel %vm536_vm10, %v1014_v31, %v533_v49  ;;  %v557_v61 = vsel %vm1548_vm0, %v556_v40, %v552_v59  ;;  %v598_v63 = vadd.f32 %v1016_v41, %v597_v60 }
 0x194   : > { %1029 = vrcp.f32 %v1581_v2  ;;  %v542_v14 = vsel %vm1554_vm1, %v541_v33, %v537_v52  ;;  %561 = vst.msk [vmem:[%s1593_s16 + $0x8] sm:$0xff] %vm559_vm15, %v557_v61  ;;  %v613_v10 = vadd.f32 %v1018_v43, %v612_v13  ;;  %v662_v55 = vmul.f32 %v1022_v56, %v661_v1 }
 0x195   : > { %560 = vst.msk [vmem:[%s1593_s16] sm:$0xff] %vm559_vm15, %v542_v14  ;;  %v602_v62 = vsel %vm601_vm13, %v1016_v41, %v598_v63  ;;  %vm1605_vm0 = vcmp.eq.f32.partialorder %v668_v5, 8.507059e+37  ;;  %v677_v17 = vmul.f32 %v1024_v47, %v676_v6  ;;  %vm679_vm1 = vweird.f32 %v1539_v26 }
 0x196   : > { %v607_v3 = vsel %vm1562_vm7, %v606_v48, %v602_v62  ;;  %v617_v8 = vsel %vm616_vm14, %v1018_v43, %v613_v10  ;;  %v663_v9 = vadd.f32 %v1022_v56, %v662_v55  ;;  %vm1699_vm2 = vweird.f32 %v1536_v22 }
 0x197   : > { %v1028_v11 = vpop.eup %1027  ;;  %v622_v18 = vsel %vm1567_vm9, %v621_v54, %v617_v8  ;;  %896 = vst.msk [vmem:[%s1593_s16 + $0x10] sm:$0xff] %vm559_vm15, %v607_v3  ;;  %vm666_vm3 = vmor %vm1699_vm2, %vm665_vm11  ;;  %v671_v19 = vor.u32 1.1754944e-38, %v670_v16  ;;  %v678_v20 = vadd.f32 %v1024_v47, %v677_v17  ;;  %vm680_vm4 = vweird.f32 %v1024_v47 }
 0x198   : > { %v725_v21 = vmul.f32 %v1028_v11, %v1572_v25  ;;  %897 = vst.msk [vmem:[%s1593_s16 + $0x18] sm:$0xff] %vm559_vm15, %v622_v18  ;;  %v667_v23 = vsel %vm666_vm3, %v1022_v56, %v663_v9  ;;  %vm681_vm5 = vmor %vm679_vm1, %vm680_vm4  ;;  %v683_v24 = vand.u32 2147483647, %v1539_v26  ;;  %v685_v27 = vand.u32 2147483648, %v1539_v26 }
 0x199   : > { %v672_v28 = vsel %vm1605_vm0, %v671_v19, %v667_v23  ;;  %v682_v22 = vsel %vm681_vm5, %v1024_v47, %v678_v20  ;;  %v735_v34 = vand.u32 2147483648, %v1572_v25  ;;  %vm730_vm7 = vweird.f32 %v1028_v11 }
 0x19a   : > { %v1030_v30 = vpop.eup %1029  ;;  %v726_v31 = vsub.f32 1.0, %v725_v21  ;;  %v686_v32 = vor.u32 1.1754944e-38, %v685_v27  ;;  %902 = vst.msk [vmem:[%s1593_s16 + $0x20] sm:$0xff] %vm559_vm15, %v672_v28  ;;  %vm684_vm6 = vcmp.eq.f32.partialorder %v683_v24, 8.507059e+37  ;;  %v733_v26 = vand.u32 2147483647, %v1572_v25 }
 0x19b   : > { %v740_v33 = vmul.f32 %v1030_v30, %v1581_v2  ;;  %vm729_vm8 = vweird.f32 %v1572_v25  ;;  %v750_v41 = vand.u32 2147483648, %v1581_v2  ;;  %v736_v42 = vor.u32 1.1754944e-38, %v735_v34 }
 0x19c   : > { %v687_v35 = vsel %vm684_vm6, %v686_v32, %v682_v22  ;;  %v727_v37 = vmul.f32 %v1028_v11, %v726_v31  ;;  %vm731_vm9 = vmor %vm729_vm8, %vm730_vm7  ;;  %vm745_vm10 = vweird.f32 %v1030_v30  ;;  %v748_v43 = vand.u32 2147483647, %v1581_v2 }
 0x19d   : > { %v741_v39 = vsub.f32 1.0, %v740_v33  ;;  %903 = vst.msk [vmem:[%s1593_s16 + $0x28] sm:$0xff] %vm559_vm15, %v687_v35  ;;  %vm734_vm11 = vcmp.eq.f32.partialorder %v733_v26, 8.507059e+37  ;;  %vm744_vm12 = vweird.f32 %v1581_v2  ;;  %v751_v48 = vor.u32 1.1754944e-38, %v750_v41 }
 0x19e   : > { %v728_v40 = vadd.f32 %v1028_v11, %v727_v37  ;;  %vm746_vm13 = vmor %vm744_vm12, %vm745_vm10  ;;  %vm749_vm14 = vcmp.eq.f32.partialorder %v748_v43, 8.507059e+37 }
 0x19f   : > { %v742_v38 = vmul.f32 %v1030_v30, %v741_v39 }
 0x1a0   : > { %v732_v44 = vsel %vm731_vm9, %v1028_v11, %v728_v40 }
 0x1a1   : > { %v737_v45 = vsel %vm734_vm11, %v736_v42, %v732_v44  ;;  %v743_v29 = vadd.f32 %v1030_v30, %v742_v38 }
 0x1a2   : > { %908 = vst.msk [vmem:[%s1593_s16 + $0x30] sm:$0xff] %vm559_vm15, %v737_v45 }
 0x1a3   : > { %v747_v50 = vsel %vm746_vm13, %v1030_v30, %v743_v29 }
 0x1a4   : > { %v752_v51 = vsel %vm749_vm14, %v751_v48, %v747_v50 }
 0x1a5   : > { %909 = vst.msk [vmem:[%s1593_s16 + $0x38] sm:$0xff] %vm559_vm15, %v752_v51 }
 0x1a6   : > { %1118 = shalt.err (!%p1115_p8)
}
 0x1a7   : > { %s1174_s21 = smov 128   ;;  %s1175_s7 = smov 8  }
 0x1a8   : > { %927 = dma.vmem_to_hbm [thread:$0]  (%p1256_p11), %s771_s1, 1024, %s773_s24, %s758_s27, %s1174_s21, %s1174_s21, %s1175_s7  }
 0x1a9 PF: > { %s787_s10 = sand.u32 1, %s1153_s17   ;;  %p1700_p9 = scmp.ge.s32.totalorder %s1165_s20, 2 }
 0x1aa   : > { %s788_s12 = scalar_lea.sflag [#allocation5], %s787_s10 }
 0x1ab   : > { %p941_p10 = pnand %p1700_p9, %p1260_p12 }
 0x1ad   : > { %p942_p1 = pneg %p941_p10 }
 0x1af   : > { %1148 = dma.done.wait (%p942_p1), %s788_s12, 1024  }
 0x1b0   : > { %1150 = vsyncadd (%p942_p1), %s788_s12, 4294966272  ;;  %p20_p2 = scmp.ge.s32.totalorder %s1229_s22, 4   ;;  %s1701_s17 = smov %s1157_s18 }
 0x1b1   : > { %s1702_s18 = smov %s1161_s19  ;;  %s1703_s19 = smov %s1241_s25 }
 0x1b2   : > { %s1704_s20 = smov %s1229_s22  ;;  %22 = sbr.rel (!%p20_p2) target bundleno = 10 (0xa), region = 93 }
 0x1b7   :  { %794 = vsyncpa [#allocation4], 1 }
 0x1b8   :  { %796 = vsyncpa [#allocation4 + $0x1], 1 }
 0x1b9   :  { %797 = vsyncpa [#allocation5], 1 }
 0x1ba   :  { %799 = vsyncpa [#allocation5 + $0x1], 1 }
 0x1bb   :  { %800 = vsyncpa [#allocation6], 1 }
 0x1bc   :  { %802 = vsyncpa [#allocation6 + $0x1], 1 }
 0x1bd   :  { %803 = vsyncpa [#allocation9], 1 }

</bundles_post_ra>
